<compile_context>
chip_gen: v7x
topology: tpu7x:2x2x1
jax: 0.10.0
libtpu: 0.0.40
codegen_flags: <defaults>
</compile_context>

<pallas_src>
import jax
import jax.numpy as jnp
from jax.experimental import pallas as pl
from jax.experimental.pallas import tpu as pltpu


# ----------------------------------------------------------------------------
# helpers
# ----------------------------------------------------------------------------
def _round_up(a, b):
    return (a + b - 1) // b * b


def _pool_tiles(C, Ho, W, itemsize):
    """Row / channel tile for the pool kernel (2-4 MiB class blocks)."""
    row_bytes = 2 * W * itemsize
    budget = 2 << 20
    if Ho * row_bytes <= budget:
        th = Ho                                   # full height: always legal
    else:
        cands = [d for d in range(8, Ho + 1, 8)
                 if Ho % d == 0 and d * row_bytes <= budget]
        th = max(cands) if cands else Ho          # guarded fallback
    tc_cap = max(1, (4 << 20) // max(1, th * row_bytes))
    tc = max(d for d in range(1, C + 1) if C % d == 0 and d <= tc_cap)
    return tc, th


# ----------------------------------------------------------------------------
# kernels
# ----------------------------------------------------------------------------
def _conv3x3s2_kernel(x0_ref, x1_ref, xh_ref, w_ref, b_ref, o_ref):
    """One (row-tile, cout-tile) block of Conv2d(k=3, s=2, p=1).

    x0_ref : (1, 1, TH*Wp, 3C)  phase py=0 rows (input rows 2r)   -> ky=0 taps
    x1_ref : (1, 1, TH*Wp, 3C)  phase py=1 rows (input rows 2r+1) -> ky=1 taps
    xh_ref : (1, 1, Wp, 3C)     py=0 halo row shared with the next row tile
    w_ref  : (3, 3C, TCO)       fused per-row-tap weights (K = 3*Cin)
    b_ref  : (1, TCO)           bias (f32)
    o_ref  : (1, TH*Wp, TCO)
    """
    rows = o_ref.shape[1]                  # TH * Wp flattened output positions
    wp = xh_ref.shape[2]                   # one phase-row worth of positions
    x0 = x0_ref[0, 0]
    x1 = x1_ref[0, 0]

    acc = jnp.dot(x0, w_ref[0], preferred_element_type=jnp.float32)
    acc = acc + jnp.dot(x1, w_ref[1], preferred_element_type=jnp.float32)
    acc = acc + b_ref[...].astype(jnp.float32)

    # ky = 2 taps read phase-0 rows shifted down by one phase row (wp positions).
    y2h = jnp.dot(xh_ref[0, 0], w_ref[2], preferred_element_type=jnp.float32)
    if rows > wp:                          # static shapes -> resolved at trace time
        y2m = jnp.dot(x0[wp:], w_ref[2], preferred_element_type=jnp.float32)
        o_ref[0, : rows - wp] = (acc[: rows - wp] + y2m).astype(o_ref.dtype)
        o_ref[0, rows - wp:] = (acc[rows - wp:] + y2h).astype(o_ref.dtype)
    else:                                  # TH == 1: halo is the whole ky=2 tap
        o_ref[0, :] = (acc + y2h).astype(o_ref.dtype)


def _avgpool2x2_kernel(x_ref, s_ref, o_ref):
    """2x2/stride-2 average pooling as one MXU matmul, NCHW-native.

    x_ref: (1, TC, TH, 2*W)   row pairs packed along the lane axis
    s_ref: (2*W, Wo)          0.25 at the 4 taps feeding each output column
    o_ref: (1, TC, TH, Wo)
    """
    _, tc, th, w2 = x_ref.shape
    wo = o_ref.shape[3]
    x2 = x_ref[0].reshape(tc * th, w2)
    y = jnp.dot(x2, s_ref[...], preferred_element_type=jnp.float32)
    o_ref[0] = y.reshape(tc, th, wo).astype(o_ref.dtype)


# ----------------------------------------------------------------------------
# conv branch wrapper
# ----------------------------------------------------------------------------
def _downsample_conv(x, weight, bias, operand_dtype):
    N, C, H, W = x.shape
    out_dtype = x.dtype
    op_dtype = jnp.dtype(operand_dtype) if operand_dtype is not None else jnp.dtype(out_dtype)
    item = op_dtype.itemsize

    Cout = weight.shape[0]
    Ho = (H - 1) // 2 + 1
    Wo = (W - 1) // 2 + 1
    q = 8 if item == 4 else 16                 # sublane quantum (packed bf16: 16)
    Wp = _round_up(Wo, q)                      # padded output width (aligned rows)
    K3 = 3 * C
    CP = _round_up(Cout, 128)                  # lane-dense output channels

    # Row tile: ~1 MiB per phase block, and cap flattened rows to bound the acc.
    th = min(Ho,
             max(1, (1 << 20) // max(1, Wp * K3 * item)),
             max(1, 4096 // Wp))
    Ho_pad = _round_up(Ho, th)
    nI = Ho_pad // th

    # Cout tile: keep the whole weight tensor resident when it is small.
    if 3 * K3 * CP * item <= (3 << 20):
        TCO = CP
    elif CP % 256 == 0:
        TCO = 256
    else:
        TCO = 128
    nJ = CP // TCO

    # One fused XLA pass: zero-pad + width-tap packing + phase/row split.
    # phc[n, py, r*Wp + s, kx*C + c] = xpad[n, c, 2r + py, 2s + kx]
    Hp = 2 * Ho_pad + 2
    Wpad = 2 * Wp + 2
    xp = jnp.pad(x, ((0, 0), (0, 0), (1, Hp - H - 1), (1, Wpad - W - 1)))
    cols = jnp.stack([xp[:, :, :, kx:kx + 2 * Wp:2] for kx in range(3)], axis=0)
    cols = cols.reshape(3, N, C, Ho_pad + 1, 2, Wp)
    phc = cols.transpose(1, 4, 3, 5, 0, 2).reshape(N, 2, (Ho_pad + 1) * Wp, K3)
    phc = phc.astype(op_dtype)

    # Weights: (Cout, Cin, 3, 3) OIHW -> (ky, kx*C + c, co), co padded to CP.
    w3 = jnp.transpose(weight, (2, 3, 1, 0)).reshape(3, K3, Cout)
    w3 = jnp.pad(w3, ((0, 0), (0, 0), (0, CP - Cout))).astype(op_dtype)
    bp = jnp.pad(bias, (0, CP - Cout)).reshape(1, CP).astype(jnp.float32)

    # Grid order: keep whichever operand has more reuse on the outer axis.
    act_bytes = 2 * (Ho_pad + 1) * Wp * K3 * item
    wt_bytes = 3 * K3 * CP * item
    j_outer = (nJ - 1) * act_bytes <= (nI - 1) * wt_bytes
    if j_outer:
        grid = (N, nJ, nI)
        sel_i = lambda a, b: b
        sel_j = lambda a, b: a
    else:
        grid = (N, nI, nJ)
        sel_i = lambda a, b: a
        sel_j = lambda a, b: b

    out = pl.pallas_call(
        _conv3x3s2_kernel,
        out_shape=jax.ShapeDtypeStruct((N, Ho_pad * Wp, CP), out_dtype),
        grid=grid,
        in_specs=[
            pl.BlockSpec((1, 1, th * Wp, K3),
                         lambda n, a, b: (n, 0, sel_i(a, b), 0)),
            pl.BlockSpec((1, 1, th * Wp, K3),
                         lambda n, a, b: (n, 1, sel_i(a, b), 0)),
            pl.BlockSpec((1, 1, Wp, K3),
                         lambda n, a, b: (n, 0, (sel_i(a, b) + 1) * th, 0)),
            pl.BlockSpec((3, K3, TCO),
                         lambda n, a, b: (0, 0, sel_j(a, b))),
            pl.BlockSpec((1, TCO),
                         lambda n, a, b: (0, sel_j(a, b))),
        ],
        out_specs=pl.BlockSpec((1, th * Wp, TCO),
                               lambda n, a, b: (n, sel_i(a, b), sel_j(a, b))),
        compiler_params=pltpu.CompilerParams(
            dimension_semantics=("parallel", "parallel", "parallel"),
            vmem_limit_bytes=40 * 1024 * 1024),
    )(phc, phc, phc, w3, bp)

    out = out.reshape(N, Ho_pad, Wp, CP)[:, :Ho, :Wo, :Cout]
    # TODO(synk): drop this NHWC->NCHW transpose (and the phase packing above)
    # when the surrounding model runs channels-last end-to-end.
    return jnp.transpose(out, (0, 3, 1, 2))


# ----------------------------------------------------------------------------
# pool branch wrapper
# ----------------------------------------------------------------------------
def _downsample_pool(x):
    N, C, H, W = x.shape
    dtype = x.dtype
    Ho, Wo = H // 2, W // 2

    xv = x
    if H % 2:
        xv = xv[:, :, :2 * Ho, :]
    xv = xv.reshape(N, C, Ho, 2 * W)            # free contiguous regroup

    TC, TH = _pool_tiles(C, Ho, W, jnp.dtype(dtype).itemsize)

    # 0.25-valued selection matrix: column s sums the 4 taps of its 2x2 window.
    k = jnp.arange(2 * W)
    s = jnp.arange(Wo)
    sel = ((k[:, None] % W) // 2 == s[None, :]) & ((k[:, None] % W) < 2 * Wo)
    smat = sel.astype(dtype) * jnp.asarray(0.25, dtype)

    grid = (N, C // TC, Ho // TH)
    return pl.pallas_call(
        _avgpool2x2_kernel,
        out_shape=jax.ShapeDtypeStruct((N, C, Ho, Wo), dtype),
        grid=grid,
        in_specs=[
            pl.BlockSpec((1, TC, TH, 2 * W), lambda n, c, r: (n, c, r, 0)),
            pl.BlockSpec((2 * W, Wo), lambda n, c, r: (0, 0)),  # resident
        ],
        out_specs=pl.BlockSpec((1, TC, TH, Wo), lambda n, c, r: (n, c, r, 0)),
        compiler_params=pltpu.CompilerParams(
            dimension_semantics=("parallel", "parallel", "parallel"),
            vmem_limit_bytes=40 * 1024 * 1024),
    )(xv, smat)


# ----------------------------------------------------------------------------
# Downsample.forward equivalent
# ----------------------------------------------------------------------------
def downsample(x_nchw, weight=None, bias=None, *, use_conv: bool,
               operand_dtype=None):
    """x_nchw: (N, Cin, H, W).  Returns NCHW output, matching PyTorch.

    operand_dtype: optional MXU operand dtype for the conv branch
    (e.g. jnp.bfloat16 on v6e/v7x); accumulation stays f32.
    """
    if use_conv:
        assert x_nchw.shape[1] == weight.shape[1], "x and conv layer don't match."
        return _downsample_conv(x_nchw, weight, bias, operand_dtype)
    return _downsample_pool(x_nchw)


# ----------------------------------------------------------------------------
# plain-JAX references for correctness checking
# ----------------------------------------------------------------------------
def _ref_conv(x, weight, bias):
    y = jax.lax.conv_general_dilated(
        x, weight, window_strides=(2, 2), padding=((1, 1), (1, 1)),
        dimension_numbers=("NCHW", "OIHW", "NCHW"))
    return y + bias[None, :, None, None]


def _ref_avgpool(x):
    ssum = jax.lax.reduce_window(x, 0.0, jax.lax.add,
                                 (1, 1, 2, 2), (1, 1, 2, 2), "VALID")
    return ssum / 4.0


# ----------------------------------------------------------------------------
if __name__ == "__main__":
    key = jax.random.PRNGKey(0)
    kx, kw, kb = jax.random.split(key, 3)

    N, Cin, H, W = 2, 4, 16, 16
    Cout = 8

    x = jax.random.normal(kx, (N, Cin, H, W), dtype=jnp.float32)

    # Deterministic Conv2d(4 -> 8, k=3) init (PyTorch-style uniform bound).
    fan_in = Cin * 3 * 3
    bound = 1.0 / (fan_in ** 0.5)
    weight = jax.random.uniform(kw, (Cout, Cin, 3, 3), jnp.float32, -bound, bound)
    bias = jax.random.uniform(kb, (Cout,), jnp.float32, -bound, bound)

    conv_fn = jax.jit(lambda a, w, b: downsample(a, w, b, use_conv=True))
    conv_bf16_fn = jax.jit(
        lambda a, w, b: downsample(a, w, b, use_conv=True,
                                   operand_dtype=jnp.bfloat16))
    pool_fn = jax.jit(lambda a: downsample(a, use_conv=False))

    # use_conv = True (f32 operands)
    y_conv = jax.block_until_ready(conv_fn(x, weight, bias))
    y_conv_ref = _ref_conv(x, weight, bias)
    assert y_conv.shape == (N, Cout, H // 2, W // 2), y_conv.shape
    assert jnp.allclose(y_conv, y_conv_ref, atol=1e-4, rtol=1e-4), (
        float(jnp.max(jnp.abs(y_conv - y_conv_ref))))

    # use_conv = True (bf16 operands, f32 accumulation) — the v6e/v7x fast path.
    y_bf16 = jax.block_until_ready(conv_bf16_fn(x, weight, bias))
    assert y_bf16.shape == (N, Cout, H // 2, W // 2), y_bf16.shape
    assert jnp.allclose(y_bf16, y_conv_ref, atol=1e-1, rtol=1e-1), (
        float(jnp.max(jnp.abs(y_bf16 - y_conv_ref))))

    # use_conv = False (AvgPool2d(2, 2))
    y_pool = jax.block_until_ready(pool_fn(x))
    y_pool_ref = _ref_avgpool(x)
    assert y_pool.shape == (N, Cin, H // 2, W // 2), y_pool.shape
    assert jnp.allclose(y_pool, y_pool_ref, atol=1e-4, rtol=1e-4), (
        float(jnp.max(jnp.abs(y_pool - y_pool_ref))))

    print("KERNEL_OK")
</pallas_src>

<mosaic_0001>
module attributes {stable_mosaic.version = 11 : i64} {
  func.func @_conv3x3s2_kernel(%arg0: i32, %arg1: i32, %arg2: i32, %arg3: memref<1x1x64x12xf32, #tpu.memory_space<vmem>>, %arg4: memref<1x1x64x12xf32, #tpu.memory_space<vmem>>, %arg5: memref<1x1x8x12xf32, #tpu.memory_space<vmem>>, %arg6: memref<3x12x128xf32, #tpu.memory_space<vmem>>, %arg7: memref<1x128xf32, #tpu.memory_space<vmem>>, %arg8: memref<1x64x128xf32, #tpu.memory_space<vmem>>) attributes {dimension_semantics = [#tpu.dimension_semantics<parallel>, #tpu.dimension_semantics<parallel>, #tpu.dimension_semantics<parallel>], iteration_bounds = array<i64: 2, 1, 1>, scalar_prefetch = 0 : i64, scratch_operands = 0 : i64, tpu.core_type = #tpu.core_type<tc>, window_params = [{transform_indices = @transform_0, window_bounds = array<i64: 1, 1, 64, 12>}, {transform_indices = @transform_1, window_bounds = array<i64: 1, 1, 64, 12>}, {transform_indices = @transform_2, window_bounds = array<i64: 1, 1, 8, 12>}, {transform_indices = @transform_3, window_bounds = array<i64: 3, 12, 128>}, {transform_indices = @transform_4, window_bounds = array<i64: 1, 128>}, {transform_indices = @transform_5, window_bounds = array<i64: 1, 64, 128>}]} {
    %c0 = arith.constant 0 : index
    %c0_0 = arith.constant 0 : index
    %c0_1 = arith.constant 0 : index
    %c0_2 = arith.constant 0 : index
    %0 = vector.load %arg3[%c0, %c0_0, %c0_1, %c0_2] : memref<1x1x64x12xf32, #tpu.memory_space<vmem>>, vector<1x1x64x12xf32>
    %1 = vector.shape_cast %0 : vector<1x1x64x12xf32> to vector<64x12xf32>
    %c0_3 = arith.constant 0 : index
    %c0_4 = arith.constant 0 : index
    %c0_5 = arith.constant 0 : index
    %c0_6 = arith.constant 0 : index
    %2 = vector.load %arg4[%c0_3, %c0_4, %c0_5, %c0_6] : memref<1x1x64x12xf32, #tpu.memory_space<vmem>>, vector<1x1x64x12xf32>
    %3 = vector.shape_cast %2 : vector<1x1x64x12xf32> to vector<64x12xf32>
    %c0_7 = arith.constant 0 : index
    %c0_8 = arith.constant 0 : index
    %c0_9 = arith.constant 0 : index
    %4 = vector.load %arg6[%c0_7, %c0_8, %c0_9] : memref<3x12x128xf32, #tpu.memory_space<vmem>>, vector<1x12x128xf32>
    %5 = vector.shape_cast %4 : vector<1x12x128xf32> to vector<12x128xf32>
    %cst = arith.constant dense<0.000000e+00> : vector<64x128xf32>
    %6 = tpu.matmul %1, %5, %cst {dimension_numbers = #tpu.dot_dimension_numbers<[1], [0], [0], [1], [0, 0, 1, 1], [], []>} : vector<64x12xf32>, vector<12x128xf32>, vector<64x128xf32> -> vector<64x128xf32>
    %c1 = arith.constant 1 : index
    %c0_10 = arith.constant 0 : index
    %c0_11 = arith.constant 0 : index
    %7 = vector.load %arg6[%c1, %c0_10, %c0_11] : memref<3x12x128xf32, #tpu.memory_space<vmem>>, vector<1x12x128xf32>
    %8 = vector.shape_cast %7 : vector<1x12x128xf32> to vector<12x128xf32>
    %cst_12 = arith.constant dense<0.000000e+00> : vector<64x128xf32>
    %9 = tpu.matmul %3, %8, %cst_12 {dimension_numbers = #tpu.dot_dimension_numbers<[1], [0], [0], [1], [0, 0, 1, 1], [], []>} : vector<64x12xf32>, vector<12x128xf32>, vector<64x128xf32> -> vector<64x128xf32>
    %10 = arith.addf %6, %9 : vector<64x128xf32>
    %c0_13 = arith.constant 0 : index
    %c0_14 = arith.constant 0 : index
    %11 = vector.load %arg7[%c0_13, %c0_14] : memref<1x128xf32, #tpu.memory_space<vmem>>, vector<1x128xf32>
    %12 = vector.broadcast %11 : vector<1x128xf32> to vector<64x128xf32>
    %13 = arith.addf %10, %12 : vector<64x128xf32>
    %c0_15 = arith.constant 0 : index
    %c0_16 = arith.constant 0 : index
    %c0_17 = arith.constant 0 : index
    %c0_18 = arith.constant 0 : index
    %14 = vector.load %arg5[%c0_15, %c0_16, %c0_17, %c0_18] : memref<1x1x8x12xf32, #tpu.memory_space<vmem>>, vector<1x1x8x12xf32>
    %15 = vector.shape_cast %14 : vector<1x1x8x12xf32> to vector<8x12xf32>
    %c2 = arith.constant 2 : index
    %c0_19 = arith.constant 0 : index
    %c0_20 = arith.constant 0 : index
    %16 = vector.load %arg6[%c2, %c0_19, %c0_20] : memref<3x12x128xf32, #tpu.memory_space<vmem>>, vector<1x12x128xf32>
    %17 = vector.shape_cast %16 : vector<1x12x128xf32> to vector<12x128xf32>
    %cst_21 = arith.constant dense<0.000000e+00> : vector<8x128xf32>
    %18 = tpu.matmul %15, %17, %cst_21 {dimension_numbers = #tpu.dot_dimension_numbers<[1], [0], [0], [1], [0, 0, 1, 1], [], []>} : vector<8x12xf32>, vector<12x128xf32>, vector<8x128xf32> -> vector<8x128xf32>
    %19 = vector.extract_strided_slice %1 {offsets = [8, 0], sizes = [56, 12], strides = [1, 1]} : vector<64x12xf32> to vector<56x12xf32>
    %c2_22 = arith.constant 2 : index
    %c0_23 = arith.constant 0 : index
    %c0_24 = arith.constant 0 : index
    %20 = vector.load %arg6[%c2_22, %c0_23, %c0_24] : memref<3x12x128xf32, #tpu.memory_space<vmem>>, vector<1x12x128xf32>
    %21 = vector.shape_cast %20 : vector<1x12x128xf32> to vector<12x128xf32>
    %cst_25 = arith.constant dense<0.000000e+00> : vector<56x128xf32>
    %22 = tpu.matmul %19, %21, %cst_25 {dimension_numbers = #tpu.dot_dimension_numbers<[1], [0], [0], [1], [0, 0, 1, 1], [], []>} : vector<56x12xf32>, vector<12x128xf32>, vector<56x128xf32> -> vector<56x128xf32>
    %23 = vector.extract_strided_slice %13 {offsets = [0, 0], sizes = [56, 128], strides = [1, 1]} : vector<64x128xf32> to vector<56x128xf32>
    %24 = arith.addf %23, %22 : vector<56x128xf32>
    %c0_26 = arith.constant 0 : index
    %c0_27 = arith.constant 0 : index
    %c0_28 = arith.constant 0 : index
    %25 = vector.load %arg8[%c0_26, %c0_27, %c0_28] : memref<1x64x128xf32, #tpu.memory_space<vmem>>, vector<1x56x128xf32>
    %26 = vector.shape_cast %25 : vector<1x56x128xf32> to vector<56x128xf32>
    %27 = vector.shape_cast %24 : vector<56x128xf32> to vector<1x56x128xf32>
    tpu.vector_store %arg8[%c0_26, %c0_27, %c0_28], %27 {strides = array<i32>} : memref<1x64x128xf32, #tpu.memory_space<vmem>>, vector<1x56x128xf32>,
    %28 = vector.extract_strided_slice %13 {offsets = [56, 0], sizes = [8, 128], strides = [1, 1]} : vector<64x128xf32> to vector<8x128xf32>
    %29 = arith.addf %28, %18 : vector<8x128xf32>
    %c0_29 = arith.constant 0 : index
    %c56 = arith.constant 56 : index
    %c0_30 = arith.constant 0 : index
    %30 = vector.load %arg8[%c0_29, %c56, %c0_30] : memref<1x64x128xf32, #tpu.memory_space<vmem>>, vector<1x8x128xf32>
    %31 = vector.shape_cast %30 : vector<1x8x128xf32> to vector<8x128xf32>
    %32 = vector.shape_cast %29 : vector<8x128xf32> to vector<1x8x128xf32>
    tpu.vector_store %arg8[%c0_29, %c56, %c0_30], %32 {strides = array<i32>} : memref<1x64x128xf32, #tpu.memory_space<vmem>>, vector<1x8x128xf32>,
    return
  }
  func.func @transform_0(%arg0: i32, %arg1: i32, %arg2: i32) -> (i32, i32, i32, i32) {
    %c0_i32 = arith.constant 0 : i32
    %c0_i32_0 = arith.constant 0 : i32
    %c0_i32_1 = arith.constant 0 : i32
    return %arg0, %c0_i32, %arg2, %c0_i32_0 : i32, i32, i32, i32
  }
  func.func @transform_1(%arg0: i32, %arg1: i32, %arg2: i32) -> (i32, i32, i32, i32) {
    %c1_i32 = arith.constant 1 : i32
    %c0_i32 = arith.constant 0 : i32
    %c0_i32_0 = arith.constant 0 : i32
    return %arg0, %c1_i32, %arg2, %c0_i32 : i32, i32, i32, i32
  }
  func.func @transform_2(%arg0: i32, %arg1: i32, %arg2: i32) -> (i32, i32, i32, i32) {
    %c1_i32 = arith.constant 1 : i32
    %0 = arith.addi %arg2, %c1_i32 : i32
    %c8_i32 = arith.constant 8 : i32
    %1 = arith.muli %0, %c8_i32 : i32
    %c0_i32 = arith.constant 0 : i32
    %c0_i32_0 = arith.constant 0 : i32
    %c0_i32_1 = arith.constant 0 : i32
    return %arg0, %c0_i32, %1, %c0_i32_0 : i32, i32, i32, i32
  }
  func.func @transform_3(%arg0: i32, %arg1: i32, %arg2: i32) -> (i32, i32, i32) {
    %c0_i32 = arith.constant 0 : i32
    %c0_i32_0 = arith.constant 0 : i32
    %c0_i32_1 = arith.constant 0 : i32
    return %c0_i32, %c0_i32_0, %arg1 : i32, i32, i32
  }
  func.func @transform_4(%arg0: i32, %arg1: i32, %arg2: i32) -> (i32, i32) {
    %c0_i32 = arith.constant 0 : i32
    %c0_i32_0 = arith.constant 0 : i32
    return %c0_i32, %arg1 : i32, i32
  }
  func.func @transform_5(%arg0: i32, %arg1: i32, %arg2: i32) -> (i32, i32, i32) {
    %c0_i32 = arith.constant 0 : i32
    return %arg0, %arg2, %arg1 : i32, i32, i32
  }
}

</mosaic_0001>

<bundles_post_ra>
// kernel: _lambda_.1
= control target key start
LH: loop header
LB: loop body
LE: loop exit
PB: predicated region body
PF: predicated region fallthrough
CT: control target
= control target key end

     0   :  { %s1369_s18 = smov 0   ;;  %s1371_s19 = smov 0   ;;  %s1501_s0 = inlined_call_operand.vmem [shape: f32[2,2,72,12], index: 0, kind: input, shape index: {}, may-alias: {0,1,2}]   ;;  %s1502_s1 = inlined_call_operand.vmem [shape: f32[2,2,72,12], index: 1, kind: input, shape index: {}, may-alias: {0,1,2}]   ;;  %s1503_s2 = inlined_call_operand.vmem [shape: f32[2,2,72,12], index: 2, kind: input, shape index: {}, may-alias: {0,1,2}]   ;;  %s1504_s3 = inlined_call_operand.vmem [shape: f32[3,12,128], index: 3, kind: input, shape index: {}]   ;;  %s1505_s4 = inlined_call_operand.vmem [shape: f32[1,128], index: 4, kind: input, shape index: {}]   ;;  %s1506_s5 = inlined_call_operand.vmem [shape: f32[2,64,128], index: 5, kind: output, shape index: {}]  }
   0x1   :  { %s1373_s20 = smov 0  }
   0x2 LB: > { %s34_s21 = sadd.s32 1, %s1329_s19  ;;  %p1104_p0 = scmp.ge.s32.totalorder %s1333_s20, 1  ;;  %s1333_s20 = sphi %s1373_s20, %s15_s20   ;;  %s1329_s19 = sphi %s1371_s19, %s1510_s19   ;;  %s1325_s18 = sphi %s1369_s18, %s1509_s18  }
   0x3   : > { %p36_p1 = scmp.ge.s32.totalorder %s34_s21, 2  ;;  %p291_p2 = scmp.lt.s32.totalorder %s1333_s20, 3 }
   0x5   : > { %s1512_s21 = smov (%p36_p1, %s34_s21), 0  ;;  %p292_p3 = pnand %p1104_p0, %p291_p2 }
   0x6   : > { %v1118_v0 = vld [vmem:[%s1504_s3 + $0x10] sm:$0xff] (!%p292_p3)  ;;  %v1119_v1 = vld [vmem:[%s1504_s3 + $0x18] sm:$0xf] (!%p292_p3)  ;;  %vm480_vm0 = vcmask (!%p292_p3), 1043456   ;;  %vm1335_vm1 = vmmov (!%p292_p3), 1   ;;  %v1336_v4 = vmov (!%p292_p3), 0.0|0.0  }
   0x7   : > { %295 = sbr.rel (%p292_p3) target bundleno = 266 (0x10a), region = 40  ;;  %v1252_v2 = vpack.c.bf16 (!%p292_p3), %v1119_v1, %v1118_v0  ;;  %vm1393_vm2 = vmpackc.low (!%p292_p3), %vm480_vm0, %vm1335_vm1  ;;  %1264 = vmatprep.subr.bf16.mxu1 (!%p292_p3), %v1336_v4  ;;  %p370_p4 = scmp.lt.s32.totalorder (!%p292_p3), %s1325_s18, 1  ;;  %v450_v5 = vld [vmem:[%s1504_s3] sm:$0xff] (!%p292_p3)  ;;  %v451_v6 = vld [vmem:[%s1504_s3 + $0x8] sm:$0xf] (!%p292_p3)  ;;  %vm1337_vm3 = vmmov (!%p292_p3), 0  }
   0x8   : > { %v1258_v7 = vpack.c.bf16 (!%p292_p3), %v451_v6, %v450_v5  ;;  %v1139_v8 = vld [vmem:[%s1504_s3 + $0x20] sm:$0xff] (!%p292_p3)  ;;  %v1140_v9 = vld [vmem:[%s1504_s3 + $0x28] sm:$0xf] (!%p292_p3)  ;;  %v1338_v11 = vmov (!%p292_p3), 0.0   ;;  %vm455_vm4 = vcmask (!%p292_p3), 97280  }
   0x9   : > { %1254 = vmatprep.subr.msk.bf16.mxu0 (!%p292_p3), %vm1393_vm2, %v1252_v2  ;;  %v1265_v10 = vpack.c.bf16 (!%p292_p3), %v1140_v9, %v1139_v8  ;;  %1224 = vmatprep.mubr.msk.f32.mxu1 (!%p292_p3), %vm1337_vm3, %v1338_v11  ;;  %v1138_v37 = vld [vmem:[%s1505_s4] ss:$0 sm:$0xff] (!%p292_p3) }
   0xa   : > { %1257 = vmatpush3.bf16.msk.msra.mxu0 (!%p292_p3), %vm1393_vm2, %v1252_v2 }
   0xb   : > { %1260 = vmatprep.subr.msk.bf16.mxu0 (!%p292_p3), %vm1393_vm2, %v1258_v7  ;;  %1267 = vmatpush3.bf16.msk.msra.mxu1 (!%p292_p3), %vm1393_vm2, %v1265_v10 }
   0xc   : > { %1268 = vmatprep.subr.bf16.mxu1 (!%p292_p3), %v1336_v4 }
   0xe   : > { %s1514_s18 = smov (!%p370_p4, %s1325_s18), 1 }
   0xf   : > { %s1280_s9 = smul.u32 144, %s1514_s18  ;;  %s1155_s26 = sshll.u32 %s1514_s18, 6 }
  0x10   : > { %s1482_s29 = scalar_lea.vmem %s1506_s5, %s1155_s26 }
  0x11   : > { %s1012_s12 = scalar_lea.vmem %s1502_s1, %s1280_s9  ;;  %s1154_s13 = sadd.s32 64, %s1280_s9 }
  0x12   : > { %v1110_v12 = vld [vmem:[%s1012_s12 + $0x48] sm:$0xff]  ;;  %v1111_v13 = vld [vmem:[%s1012_s12 + $0x50] sm:$0xff]  ;;  %s411_s16 = scalar_lea.vmem %s1503_s2, %s1154_s13  ;;  %v1112_v14 = vld [vmem:[%s1012_s12 + $0x58] sm:$0xff]  ;;  %s1431_s23 = scalar_lea.vmem %s1501_s0, %s1280_s9 }
  0x13   : > { %1192 = vmatprep.mubr.msk.f32.mxu0 %vm455_vm4, %v1110_v12  ;;  %v736_v15 = vld [vmem:[%s411_s16] sm:$0xff]  ;;  %v435_v17 = vld [vmem:[%s1431_s23 + $0x8] sm:$0xff]  ;;  %v1115_v19 = vld [vmem:[%s1012_s12 + $0x70] sm:$0xff] }
  0x14   : > { %1193 = vmatmul.mubr.msk.f32.vlgmr.msra.gmra.mrb[0].mxu0 %vm455_vm4, %v1111_v13  ;;  %1225 = vmatmul.mubr.msk.f32.vlgmr.msra.gmra.mrb[0].mxu1 %vm455_vm4, %v736_v15  ;;  %v1113_v16 = vld [vmem:[%s1012_s12 + $0x60] sm:$0xff]  ;;  %v1114_v18 = vld [vmem:[%s1012_s12 + $0x68] sm:$0xff]  ;;  %v436_v20 = vld [vmem:[%s1431_s23 + $0x10] sm:$0xff] }
  0x15   : > { %1263 = vmatpush3.bf16.msk.msra.mxu0 %vm1393_vm2, %v1258_v7  ;;  %1195 = vmatprep.mubr.msk.f32.mxu0 %vm455_vm4, %v1112_v14  ;;  %v1116_v21 = vld [vmem:[%s1012_s12 + $0x78] sm:$0xff]  ;;  %v1117_v22 = vld [vmem:[%s1012_s12 + $0x80] sm:$0xff]  ;;  %v439_v26 = vld [vmem:[%s1431_s23 + $0x28] sm:$0xff] }
  0x16   : > { %1271 = vmatpush3.bf16.msk.msra.mxu1 %vm1393_vm2, %v1265_v10  ;;  %1231 = vmatprep.mubr.msk.f32.mxu1 %vm1337_vm3, %v1338_v11  ;;  %v437_v23 = vld [vmem:[%s1431_s23 + $0x18] sm:$0xff]  ;;  %v434_v24 = vld [vmem:[%s1431_s23] sm:$0xff]  ;;  %v440_v27 = vld [vmem:[%s1431_s23 + $0x30] sm:$0xff] }
  0x17   : > { %v438_v25 = vld [vmem:[%s1431_s23 + $0x20] sm:$0xff]  ;;  %v441_v28 = vld [vmem:[%s1431_s23 + $0x38] sm:$0xff] }
  0x18   : > { %1196 = vmatmul.mubr.msk.f32.gmra.mrb[2].mxu0 %vm455_vm4, %v1113_v16 }
  0x19   : > { %1232 = vmatmul.mubr.msk.f32.vlgmr.msra.gmra.mrb[2].mxu1 %vm455_vm4, %v435_v17  ;;  %1198 = vmatprep.mubr.msk.f32.mxu0 %vm455_vm4, %v1114_v18 }
  0x1a   : > { %1234 = vmatprep.mubr.msk.f32.mxu1 %vm1337_vm3, %v1338_v11 }
  0x1c   : > { %1199 = vmatmul.mubr.msk.f32.gmra.mrb[4].mxu0 %vm455_vm4, %v1115_v19 }
  0x1d   : > { %1235 = vmatmul.mubr.msk.f32.gmra.mrb[4].mxu1 %vm455_vm4, %v436_v20  ;;  %1201 = vmatprep.mubr.msk.f32.mxu0 %vm455_vm4, %v1116_v21 }
  0x1e   : > { %1237 = vmatprep.mubr.msk.f32.mxu1 %vm1337_vm3, %v1338_v11 }
  0x20   : > { %1202 = vmatmul.mubr.msk.f32.gmra.mrb[6].mxu0 %vm455_vm4, %v1117_v22 }
  0x21   : > { %1238 = vmatmul.mubr.msk.f32.gmra.mrb[6].mxu1 %vm455_vm4, %v437_v23  ;;  %1208 = vmatprep.mubr.msk.f32.mxu0 %vm455_vm4, %v434_v24 }
  0x22   : > { %1240 = vmatprep.mubr.msk.f32.mxu1 %vm1337_vm3, %v1338_v11 }
  0x24   : > { %1209 = vmatmul.mubr.msk.f32.vlgmr.msra.gmra.mrb[0].mxu0 %vm455_vm4, %v435_v17 }
  0x25   : > { %1241 = vmatmul.mubr.msk.f32.gmra.mrb[8].mxu1 %vm455_vm4, %v438_v25  ;;  %1211 = vmatprep.mubr.msk.f32.mxu0 %vm455_vm4, %v436_v20 }
  0x26   : > { %1243 = vmatprep.mubr.msk.f32.mxu1 %vm1337_vm3, %v1338_v11 }
  0x28   : > { %1212 = vmatmul.mubr.msk.f32.gmra.mrb[2].mxu0 %vm455_vm4, %v437_v23 }
  0x29   : > { %1244 = vmatmul.mubr.msk.f32.gmra.mrb[10].mxu1 %vm455_vm4, %v439_v26  ;;  %1214 = vmatprep.mubr.msk.f32.mxu0 %vm455_vm4, %v438_v25 }
  0x2a   : > { %1246 = vmatprep.mubr.msk.f32.mxu1 %vm1337_vm3, %v1338_v11 }
  0x2c   : > { %1215 = vmatmul.mubr.msk.f32.gmra.mrb[4].mxu0 %vm455_vm4, %v439_v26 }
  0x2d   : > { %1247 = vmatmul.mubr.msk.f32.gmra.mrb[12].mxu1 %vm455_vm4, %v440_v27  ;;  %1217 = vmatprep.mubr.msk.f32.mxu0 %vm455_vm4, %v440_v27 }
  0x2e   : > { %1249 = vmatprep.mubr.msk.f32.mxu1 %vm1337_vm3, %v1338_v11 }
  0x30   : > { %1218 = vmatmul.mubr.msk.f32.gmra.mrb[6].mxu0 %vm455_vm4, %v441_v28 }
  0x31   : > { %1250 = vmatmul.mubr.msk.f32.gmra.mrb[14].mxu1 %vm455_vm4, %v441_v28 }
  0xe7   : > { %v812_v29 = vpop.f32.mrb[0].mxu1 }
  0xe8   : > { %v1226_v30 = vpop.f32.mrb[1].mxu1 }
  0xec   : > { %v882_v31 = vpop.f32.mrb[2].mxu1 }
  0xed   : > { %v1233_v32 = vpop.f32.mrb[3].mxu1 }
  0xf0   : > { %v887_v33 = vpop.f32.mrb[4].mxu1 }
  0xf1   : > { %v1236_v34 = vpop.f32.mrb[5].mxu1 }
  0xf4   : > { %v892_v35 = vpop.f32.mrb[6].mxu1 }
  0xf5   : > { %v1239_v36 = vpop.f32.mrb[7].mxu1 }
  0xf7   : > { %v1210_v38 = vpop.f32.mrb[0].mxu0 }
  0xf8   : > { %v729_v39 = vadd.f32 %v1210_v38, %v1138_v37  ;;  %v682_v40 = vpop.f32.mrb[1].mxu0  ;;  %v897_v41 = vpop.f32.mrb[8].mxu1 }
  0xf9   : > { %v728_v42 = vadd.f32 %v1138_v37, %v682_v40  ;;  %v1242_v43 = vpop.f32.mrb[9].mxu1 }
  0xfa   : > { %v917_v44 = vadd.f32 %v887_v33, %v729_v39 }
  0xfb   : > { %v916_v45 = vadd.f32 %v882_v31, %v728_v42  ;;  %v1213_v46 = vpop.f32.mrb[2].mxu0 }
  0xfc   : > { %924 = vst [vmem:[%s1482_s29 + $0x8] sm:$0xff] %v917_v44  ;;  %v731_v47 = vadd.f32 %v1213_v46, %v1138_v37  ;;  %v692_v48 = vpop.f32.mrb[3].mxu0  ;;  %v902_v49 = vpop.f32.mrb[10].mxu1 }
  0xfd   : > { %923 = vst [vmem:[%s1482_s29] sm:$0xff] %v916_v45  ;;  %v730_v50 = vadd.f32 %v1138_v37, %v692_v48  ;;  %v1245_v51 = vpop.f32.mrb[11].mxu1 }
  0xfe   : > { %v919_v52 = vadd.f32 %v897_v41, %v731_v47 }
  0xff   : > { %v918_v53 = vadd.f32 %v892_v35, %v730_v50  ;;  %v1216_v54 = vpop.f32.mrb[4].mxu0 }
 0x100   : > { %926 = vst [vmem:[%s1482_s29 + $0x18] sm:$0xff] %v919_v52  ;;  %v733_v55 = vadd.f32 %v1216_v54, %v1138_v37  ;;  %v702_v56 = vpop.f32.mrb[5].mxu0  ;;  %v907_v57 = vpop.f32.mrb[12].mxu1 }
 0x101   : > { %925 = vst [vmem:[%s1482_s29 + $0x10] sm:$0xff] %v918_v53  ;;  %v732_v58 = vadd.f32 %v1138_v37, %v702_v56  ;;  %v1248_v59 = vpop.f32.mrb[13].mxu1 }
 0x102   : > { %v921_v60 = vadd.f32 %v907_v57, %v733_v55 }
 0x103   : > { %v920_v61 = vadd.f32 %v902_v49, %v732_v58  ;;  %v1219_v62 = vpop.f32.mrb[6].mxu0 }
 0x104   : > { %928 = vst [vmem:[%s1482_s29 + $0x28] sm:$0xff] %v921_v60  ;;  %v735_v63 = vadd.f32 %v1219_v62, %v1138_v37  ;;  %v712_v0 = vpop.f32.mrb[7].mxu0  ;;  %v912_v1 = vpop.f32.mrb[14].mxu1 }
 0x105   : > { %927 = vst [vmem:[%s1482_s29 + $0x20] sm:$0xff] %v920_v61  ;;  %v734_v2 = vadd.f32 %v1138_v37, %v712_v0  ;;  %v1251_v3 = vpop.f32.mrb[15].mxu1 }
 0x106   : > { %v930_v4 = vadd.f32 %v812_v29, %v735_v63 }
 0x107   : > { %v922_v5 = vadd.f32 %v912_v1, %v734_v2 }
 0x108   : > { %931 = vst [vmem:[%s1482_s29 + $0x38] sm:$0xff] %v930_v4 }
 0x109   : > { %929 = vst [vmem:[%s1482_s29 + $0x30] sm:$0xff] %v922_v5 }
 0x10a PF: > { %s15_s20 = sadd.s32 1, %s1333_s20   ;;  %s1509_s18 = smov %s1329_s19 }
 0x10b   : > { %p12_p5 = scmp.ge.s32.totalorder %s15_s20, 4   ;;  %s1510_s19 = smov %s1512_s21 }
 0x10d   :  { %14 = sbr.rel (!%p12_p5) target bundleno = 2 (0x2), region = 84 }

</bundles_post_ra>
